<compile_context>
chip_gen: v7x
topology: tpu7x:2x2x1
jax: 0.10.0
libtpu: 0.0.40
codegen_flags: <defaults>
</compile_context>

<pallas_src>
import functools

import jax
import jax.numpy as jnp
from jax import lax
from jax.experimental import pallas as pl
from jax.experimental.pallas import tpu as pltpu
import numpy as np

# config['Params']['focal_loss_gamma'] is external in the original code; fixed
# here as a numeric constant so the focal-weighting branch is exercised.
FOCAL_GAMMA = 2.0


def _focal_weight(one_minus_p, gamma):
    """(1 - p)**gamma with a VPU-only fast path for static integer gamma."""
    g = float(gamma)
    if g.is_integer() and 0.0 <= g <= 16.0:
        e = int(g)
        result = jnp.ones_like(one_minus_p)
        base = one_minus_p
        while e > 0:                      # static exponentiation-by-squaring
            if e & 1:
                result = result * base
            e >>= 1
            if e:
                base = base * base
        return result
    # Non-integer gamma: fall back to the EUP pow path.
    return jnp.power(one_minus_p, g)


def _nce_kernel(c_ref, z_ref, w_ref, b_ref, out_ref, *, num_steps, z_dim, gamma):
    f32 = jnp.float32
    B = c_ref.shape[0]

    # All T Linear layers in one MXU pass: (B, H) @ (H, T*Z) -> (B, T*Z) f32.
    pred_all = jnp.dot(c_ref[...], w_ref[...], preferred_element_type=f32)
    pred_all = pred_all + b_ref[...]

    row_ids = lax.broadcasted_iota(jnp.int32, (B, B), 0)
    col_ids = lax.broadcasted_iota(jnp.int32, (B, B), 1)
    eye_mask = row_ids == col_ids

    # Per-column NCE accumulator: a single lane reduction at the very end.
    nce_vec = jnp.zeros((1, B), dtype=f32)
    acc = None
    # T is small and static: a full Python unroll keeps every slice offset
    # static (no dynamic lane/sublane shifts) and gives the LLO scheduler
    # straight-line visibility over all MXU/EUP/XLU work (same effect as
    # lax.fori_loop(..., unroll=True) at these trip counts).
    for k in range(num_steps):
        sl = slice(k * z_dim, (k + 1) * z_dim)
        z_k = z_ref[:, sl]                              # (B, Z), matmul dtype
        pred_k = pred_all[:, sl].astype(z_ref.dtype)    # back to matmul dtype
        # total = z_k @ pred_k^T via dot_general contracting last dims (no .T).
        total = lax.dot_general(
            z_k, pred_k,
            dimension_numbers=(((1,), (1,)), ((), ())),
            preferred_element_type=f32)                 # (B, B), f32

        # Column-wise (dim=0) softmax / log-softmax; only diagonal entries used.
        col_max = jnp.max(total, axis=0, keepdims=True)                     # (1, B)
        lse = jnp.log(jnp.sum(jnp.exp(total - col_max), axis=0,
                              keepdims=True)) + col_max                     # (1, B)
        diag = jnp.sum(jnp.where(eye_mask, total, 0.0), axis=0,
                       keepdims=True)                                       # (1, B)
        lsm_diag = diag - lse                                               # (1, B)
        sm_diag = jnp.exp(lsm_diag)                                         # (1, B)

        focal = _focal_weight(1.0 - sm_diag, gamma)
        focal = jnp.where(focal == 0.0, 1.0, focal)     # torch.where(==0, 1, .)
        nce_vec = nce_vec + focal * lsm_diag

        if k == num_steps - 1:
            # Accuracy: argmax over dim 0 of the LAST step's logits (first-index
            # ties), matching the PyTorch code where only the final iteration's
            # `correct` survives. Reuses this step's col_max.
            amax = jnp.min(jnp.where(total == col_max, row_ids, B), axis=0,
                           keepdims=True)                                   # (1, B)
            target = lax.broadcasted_iota(jnp.int32, (1, B), 1)
            correct = jnp.sum((amax == target).astype(f32), axis=1,
                              keepdims=True)                                # (1, 1)
            acc = correct * (1.0 / B)

    nce = jnp.sum(nce_vec, axis=1, keepdims=True) * (-1.0 / (B * num_steps))  # (1, 1)

    # Pack both scalars into one lane-dense (1, 128) row: lane 0 = nce, lane 1 = acc.
    lane = lax.broadcasted_iota(jnp.int32, out_ref.shape, 1)
    out_ref[...] = jnp.where(lane == 0, nce, 0.0) + jnp.where(lane == 1, acc, 0.0)


def nce_loss_pallas(c_t, z_out, W, b, gamma=FOCAL_GAMMA, matmul_dtype=jnp.bfloat16):
    """c_t: (B,H) f32, z_out: (B,T,Z) f32, W: (T,Z,H) f32, b: (T,Z) f32.

    Returns (nce, acc) as f32 scalars. `matmul_dtype` is the MXU operand dtype
    (bf16 is native on v5e/v6e/v7x; pass jnp.float32 to disable the cast).
    Accumulation and all softmax / focal math are always float32.
    """
    B, H = c_t.shape
    T, Z, H_w = W.shape
    assert H_w == H and z_out.shape == (B, T, Z) and b.shape == (T, Z)
    mm_dtype = jnp.dtype(matmul_dtype)

    # Copy-free row-major reshapes; no wrapper-side HBM transpose of z_out.
    z2d = z_out.reshape(B, T * Z).astype(mm_dtype)            # (B, T*Z)
    # Stacked Linear weights laid out as (H, T*Z) so the fused Linear is a plain
    # (B,H)@(H,T*Z) matmul with zero in-kernel transposes. (In a real model the
    # parameters would simply be stored in this layout; here it is one tiny op.)
    w2d = W.reshape(T * Z, H).T.astype(mm_dtype)              # (H, T*Z)
    b2d = b.reshape(1, T * Z).astype(jnp.float32)             # (1, T*Z)
    c2d = c_t.astype(mm_dtype)                                # (B, H)

    # TODO(synk): for production-sized B, tile the (B,B) logits column-wise over
    # a "parallel" grid axis (column softmax is independent per column) to use
    # v7x megacore and respect its 64 MiB VMEM; at these shapes a single
    # invocation is strictly faster.
    kernel = functools.partial(_nce_kernel, num_steps=T, z_dim=Z, gamma=gamma)
    out = pl.pallas_call(
        kernel,
        out_shape=jax.ShapeDtypeStruct((1, 128), jnp.float32),
        in_specs=[
            pl.BlockSpec(memory_space=pltpu.VMEM),   # c_t        (B, H)
            pl.BlockSpec(memory_space=pltpu.VMEM),   # z_out      (B, T*Z)
            pl.BlockSpec(memory_space=pltpu.VMEM),   # W stacked  (H, T*Z)
            pl.BlockSpec(memory_space=pltpu.VMEM),   # b stacked  (1, T*Z)
        ],
        out_specs=pl.BlockSpec(memory_space=pltpu.VMEM),
    )(c2d, z2d, w2d, b2d)
    return out[0, 0], out[0, 1]


def nce_loss_ref(c_t, z_out, W, b, gamma=FOCAL_GAMMA, matmul_dtype=None):
    """Pure-JAX reference mirroring the PyTorch forward.

    If `matmul_dtype` is given, matmul operands are rounded to that dtype (with
    float32 accumulation), mirroring the kernel's MXU input dtype so the
    comparison is apples-to-apples.
    """
    B = c_t.shape[0]
    T = W.shape[0]
    if matmul_dtype is not None:
        c_mm = c_t.astype(matmul_dtype)
        z_mm = z_out.astype(matmul_dtype)
        W_mm = W.astype(matmul_dtype)
    else:
        c_mm, z_mm, W_mm = c_t, z_out, W

    nce = jnp.float32(0.0)
    total = None
    for k in range(T):
        pred = jnp.dot(c_mm, W_mm[k].T,
                       preferred_element_type=jnp.float32) + b[k]           # (B, Z)
        pred_mm = pred.astype(matmul_dtype) if matmul_dtype is not None else pred
        total = jnp.dot(z_mm[:, k, :], pred_mm.T,
                        preferred_element_type=jnp.float32)                 # (B, B)
        lsm_diag = jnp.diag(jax.nn.log_softmax(total, axis=0))
        sm_diag = jnp.diag(jax.nn.softmax(total, axis=0))
        focal = jnp.power(1.0 - sm_diag, gamma)
        focal = jnp.where(focal == 0.0, 1.0, focal)
        nce = nce + jnp.sum(focal * lsm_diag)
    nce = nce / (-1.0 * B * T)
    correct = jnp.sum(jnp.argmax(total, axis=0) == jnp.arange(B))
    acc = correct.astype(jnp.float32) / B
    return nce, acc


if __name__ == "__main__":
    B, H, Z, T = 8, 32, 32, 4   # batch, context dim, latent dim, prediction steps

    key = jax.random.PRNGKey(0)
    k1, k2, k3, k4 = jax.random.split(key, 4)
    c_t = jax.random.normal(k1, (B, H), dtype=jnp.float32)
    z_out = jax.random.normal(k2, (B, T, Z), dtype=jnp.float32)
    # deterministic nn.Linear-like init: U(-1/sqrt(H), 1/sqrt(H))
    lim = 1.0 / np.sqrt(H)
    W = jax.random.uniform(k3, (T, Z, H), jnp.float32, -lim, lim)
    b = jax.random.uniform(k4, (T, Z), jnp.float32, -lim, lim)

    nce, acc = jax.jit(nce_loss_pallas)(c_t, z_out, W, b)
    jax.block_until_ready((nce, acc))

    # Reference gets the same bf16 MXU-operand rounding as the kernel; all
    # accumulation / softmax / focal math is f32 in both.
    nce_r, acc_r = nce_loss_ref(c_t, z_out, W, b, matmul_dtype=jnp.bfloat16)
    np.testing.assert_allclose(np.asarray(nce), np.asarray(nce_r),
                               rtol=2e-3, atol=2e-4)
    np.testing.assert_allclose(np.asarray(acc), np.asarray(acc_r),
                               rtol=1e-6, atol=1e-6)

    print("KERNEL_OK")
</pallas_src>

<mosaic_0001>
module attributes {stable_mosaic.version = 11 : i64} {
  func.func @_nce_kernel(%arg0: memref<8x32xbf16, #tpu.memory_space<vmem>>, %arg1: memref<8x128xbf16, #tpu.memory_space<vmem>>, %arg2: memref<32x128xbf16, #tpu.memory_space<vmem>>, %arg3: memref<1x128xf32, #tpu.memory_space<vmem>>, %arg4: memref<1x128xf32, #tpu.memory_space<vmem>>) attributes {dimension_semantics = [], scalar_prefetch = 0 : i64, scratch_operands = 0 : i64, tpu.core_type = #tpu.core_type<tc>} {
    %c0 = arith.constant 0 : index
    %c0_0 = arith.constant 0 : index
    %0 = vector.load %arg0[%c0, %c0_0] : memref<8x32xbf16, #tpu.memory_space<vmem>>, vector<8x32xbf16>
    %c0_1 = arith.constant 0 : index
    %c0_2 = arith.constant 0 : index
    %1 = vector.load %arg2[%c0_1, %c0_2] : memref<32x128xbf16, #tpu.memory_space<vmem>>, vector<32x128xbf16>
    %cst = arith.constant dense<0.000000e+00> : vector<8x128xf32>
    %2 = tpu.matmul %0, %1, %cst {dimension_numbers = #tpu.dot_dimension_numbers<[1], [0], [0], [1], [0, 0, 1, 1], [], []>} : vector<8x32xbf16>, vector<32x128xbf16>, vector<8x128xf32> -> vector<8x128xf32>
    %c0_3 = arith.constant 0 : index
    %c0_4 = arith.constant 0 : index
    %3 = vector.load %arg3[%c0_3, %c0_4] : memref<1x128xf32, #tpu.memory_space<vmem>>, vector<1x128xf32>
    %4 = vector.broadcast %3 : vector<1x128xf32> to vector<8x128xf32>
    %5 = arith.addf %2, %4 : vector<8x128xf32>
    %6 = tpu.iota {dimensions = array<i32: 0>} : vector<8x8xi32>
    %7 = tpu.iota {dimensions = array<i32: 1>} : vector<8x8xi32>
    %8 = arith.cmpi eq, %6, %7 : vector<8x8xi32>
    %cst_5 = arith.constant 0.000000e+00 : f32
    %9 = vector.broadcast %cst_5 : f32 to vector<1x8xf32>
    %c0_6 = arith.constant 0 : index
    %c0_7 = arith.constant 0 : index
    %10 = vector.load %arg1[%c0_6, %c0_7] : memref<8x128xbf16, #tpu.memory_space<vmem>>, vector<8x32xbf16>
    %11 = vector.extract_strided_slice %5 {offsets = [0, 0], sizes = [8, 32], strides = [1, 1]} : vector<8x128xf32> to vector<8x32xf32>
    %12 = arith.truncf %11 : vector<8x32xf32> to vector<8x32xbf16>
    %cst_8 = arith.constant dense<0.000000e+00> : vector<8x8xf32>
    %13 = tpu.matmul %10, %12, %cst_8 {dimension_numbers = #tpu.dot_dimension_numbers<[1], [1], [0], [0], [0, 0, 1, 0], [], []>} : vector<8x32xbf16>, vector<8x32xbf16>, vector<8x8xf32> -> vector<8x8xf32>
    %cst_9 = arith.constant dense<0xFF800000> : vector<8xf32>
    %14 = vector.multi_reduction <maximumf>, %13, %cst_9 [0] : vector<8x8xf32> to vector<8xf32>
    %15 = vector.shape_cast %14 : vector<8xf32> to vector<1x8xf32>
    %16 = vector.broadcast %15 : vector<1x8xf32> to vector<8x8xf32>
    %17 = arith.subf %13, %16 : vector<8x8xf32>
    %18 = math.exp %17 : vector<8x8xf32>
    %cst_10 = arith.constant dense<0.000000e+00> : vector<8xf32>
    %19 = vector.multi_reduction <add>, %18, %cst_10 [0] : vector<8x8xf32> to vector<8xf32>
    %20 = vector.shape_cast %19 : vector<8xf32> to vector<1x8xf32>
    %21 = math.log %20 : vector<1x8xf32>
    %22 = arith.addf %21, %15 : vector<1x8xf32>
    %cst_11 = arith.constant 0.000000e+00 : f32
    %23 = vector.broadcast %cst_11 : f32 to vector<8x8xf32>
    %24 = arith.select %8, %13, %23 : vector<8x8xi1>, vector<8x8xf32>
    %cst_12 = arith.constant dense<0.000000e+00> : vector<8xf32>
    %25 = vector.multi_reduction <add>, %24, %cst_12 [0] : vector<8x8xf32> to vector<8xf32>
    %26 = vector.shape_cast %25 : vector<8xf32> to vector<1x8xf32>
    %27 = arith.subf %26, %22 : vector<1x8xf32>
    %28 = math.exp %27 : vector<1x8xf32>
    %cst_13 = arith.constant 1.000000e+00 : f32
    %29 = vector.broadcast %cst_13 : f32 to vector<1x8xf32>
    %30 = arith.subf %29, %28 : vector<1x8xf32>
    %cst_14 = arith.constant 1.000000e+00 : f32
    %31 = vector.broadcast %cst_14 : f32 to vector<1x8xf32>
    %32 = arith.mulf %30, %30 : vector<1x8xf32>
    %33 = arith.mulf %31, %32 : vector<1x8xf32>
    %cst_15 = arith.constant 0.000000e+00 : f32
    %34 = vector.broadcast %cst_15 : f32 to vector<1x8xf32>
    %35 = arith.cmpf oeq, %33, %34 : vector<1x8xf32>
    %cst_16 = arith.constant 1.000000e+00 : f32
    %36 = vector.broadcast %cst_16 : f32 to vector<1x8xf32>
    %37 = arith.select %35, %36, %33 : vector<1x8xi1>, vector<1x8xf32>
    %38 = arith.mulf %37, %27 : vector<1x8xf32>
    %39 = arith.addf %9, %38 : vector<1x8xf32>
    %c0_17 = arith.constant 0 : index
    %c32 = arith.constant 32 : index
    %40 = vector.load %arg1[%c0_17, %c32] : memref<8x128xbf16, #tpu.memory_space<vmem>>, vector<8x32xbf16>
    %41 = vector.extract_strided_slice %5 {offsets = [0, 32], sizes = [8, 32], strides = [1, 1]} : vector<8x128xf32> to vector<8x32xf32>
    %42 = arith.truncf %41 : vector<8x32xf32> to vector<8x32xbf16>
    %cst_18 = arith.constant dense<0.000000e+00> : vector<8x8xf32>
    %43 = tpu.matmul %40, %42, %cst_18 {dimension_numbers = #tpu.dot_dimension_numbers<[1], [1], [0], [0], [0, 0, 1, 0], [], []>} : vector<8x32xbf16>, vector<8x32xbf16>, vector<8x8xf32> -> vector<8x8xf32>
    %cst_19 = arith.constant dense<0xFF800000> : vector<8xf32>
    %44 = vector.multi_reduction <maximumf>, %43, %cst_19 [0] : vector<8x8xf32> to vector<8xf32>
    %45 = vector.shape_cast %44 : vector<8xf32> to vector<1x8xf32>
    %46 = vector.broadcast %45 : vector<1x8xf32> to vector<8x8xf32>
    %47 = arith.subf %43, %46 : vector<8x8xf32>
    %48 = math.exp %47 : vector<8x8xf32>
    %cst_20 = arith.constant dense<0.000000e+00> : vector<8xf32>
    %49 = vector.multi_reduction <add>, %48, %cst_20 [0] : vector<8x8xf32> to vector<8xf32>
    %50 = vector.shape_cast %49 : vector<8xf32> to vector<1x8xf32>
    %51 = math.log %50 : vector<1x8xf32>
    %52 = arith.addf %51, %45 : vector<1x8xf32>
    %cst_21 = arith.constant 0.000000e+00 : f32
    %53 = vector.broadcast %cst_21 : f32 to vector<8x8xf32>
    %54 = arith.select %8, %43, %53 : vector<8x8xi1>, vector<8x8xf32>
    %cst_22 = arith.constant dense<0.000000e+00> : vector<8xf32>
    %55 = vector.multi_reduction <add>, %54, %cst_22 [0] : vector<8x8xf32> to vector<8xf32>
    %56 = vector.shape_cast %55 : vector<8xf32> to vector<1x8xf32>
    %57 = arith.subf %56, %52 : vector<1x8xf32>
    %58 = math.exp %57 : vector<1x8xf32>
    %cst_23 = arith.constant 1.000000e+00 : f32
    %59 = vector.broadcast %cst_23 : f32 to vector<1x8xf32>
    %60 = arith.subf %59, %58 : vector<1x8xf32>
    %cst_24 = arith.constant 1.000000e+00 : f32
    %61 = vector.broadcast %cst_24 : f32 to vector<1x8xf32>
    %62 = arith.mulf %60, %60 : vector<1x8xf32>
    %63 = arith.mulf %61, %62 : vector<1x8xf32>
    %cst_25 = arith.constant 0.000000e+00 : f32
    %64 = vector.broadcast %cst_25 : f32 to vector<1x8xf32>
    %65 = arith.cmpf oeq, %63, %64 : vector<1x8xf32>
    %cst_26 = arith.constant 1.000000e+00 : f32
    %66 = vector.broadcast %cst_26 : f32 to vector<1x8xf32>
    %67 = arith.select %65, %66, %63 : vector<1x8xi1>, vector<1x8xf32>
    %68 = arith.mulf %67, %57 : vector<1x8xf32>
    %69 = arith.addf %39, %68 : vector<1x8xf32>
    %c0_27 = arith.constant 0 : index
    %c64 = arith.constant 64 : index
    %70 = vector.load %arg1[%c0_27, %c64] : memref<8x128xbf16, #tpu.memory_space<vmem>>, vector<8x32xbf16>
    %71 = vector.extract_strided_slice %5 {offsets = [0, 64], sizes = [8, 32], strides = [1, 1]} : vector<8x128xf32> to vector<8x32xf32>
    %72 = arith.truncf %71 : vector<8x32xf32> to vector<8x32xbf16>
    %cst_28 = arith.constant dense<0.000000e+00> : vector<8x8xf32>
    %73 = tpu.matmul %70, %72, %cst_28 {dimension_numbers = #tpu.dot_dimension_numbers<[1], [1], [0], [0], [0, 0, 1, 0], [], []>} : vector<8x32xbf16>, vector<8x32xbf16>, vector<8x8xf32> -> vector<8x8xf32>
    %cst_29 = arith.constant dense<0xFF800000> : vector<8xf32>
    %74 = vector.multi_reduction <maximumf>, %73, %cst_29 [0] : vector<8x8xf32> to vector<8xf32>
    %75 = vector.shape_cast %74 : vector<8xf32> to vector<1x8xf32>
    %76 = vector.broadcast %75 : vector<1x8xf32> to vector<8x8xf32>
    %77 = arith.subf %73, %76 : vector<8x8xf32>
    %78 = math.exp %77 : vector<8x8xf32>
    %cst_30 = arith.constant dense<0.000000e+00> : vector<8xf32>
    %79 = vector.multi_reduction <add>, %78, %cst_30 [0] : vector<8x8xf32> to vector<8xf32>
    %80 = vector.shape_cast %79 : vector<8xf32> to vector<1x8xf32>
    %81 = math.log %80 : vector<1x8xf32>
    %82 = arith.addf %81, %75 : vector<1x8xf32>
    %cst_31 = arith.constant 0.000000e+00 : f32
    %83 = vector.broadcast %cst_31 : f32 to vector<8x8xf32>
    %84 = arith.select %8, %73, %83 : vector<8x8xi1>, vector<8x8xf32>
    %cst_32 = arith.constant dense<0.000000e+00> : vector<8xf32>
    %85 = vector.multi_reduction <add>, %84, %cst_32 [0] : vector<8x8xf32> to vector<8xf32>
    %86 = vector.shape_cast %85 : vector<8xf32> to vector<1x8xf32>
    %87 = arith.subf %86, %82 : vector<1x8xf32>
    %88 = math.exp %87 : vector<1x8xf32>
    %cst_33 = arith.constant 1.000000e+00 : f32
    %89 = vector.broadcast %cst_33 : f32 to vector<1x8xf32>
    %90 = arith.subf %89, %88 : vector<1x8xf32>
    %cst_34 = arith.constant 1.000000e+00 : f32
    %91 = vector.broadcast %cst_34 : f32 to vector<1x8xf32>
    %92 = arith.mulf %90, %90 : vector<1x8xf32>
    %93 = arith.mulf %91, %92 : vector<1x8xf32>
    %cst_35 = arith.constant 0.000000e+00 : f32
    %94 = vector.broadcast %cst_35 : f32 to vector<1x8xf32>
    %95 = arith.cmpf oeq, %93, %94 : vector<1x8xf32>
    %cst_36 = arith.constant 1.000000e+00 : f32
    %96 = vector.broadcast %cst_36 : f32 to vector<1x8xf32>
    %97 = arith.select %95, %96, %93 : vector<1x8xi1>, vector<1x8xf32>
    %98 = arith.mulf %97, %87 : vector<1x8xf32>
    %99 = arith.addf %69, %98 : vector<1x8xf32>
    %c0_37 = arith.constant 0 : index
    %c96 = arith.constant 96 : index
    %100 = vector.load %arg1[%c0_37, %c96] : memref<8x128xbf16, #tpu.memory_space<vmem>>, vector<8x32xbf16>
    %101 = vector.extract_strided_slice %5 {offsets = [0, 96], sizes = [8, 32], strides = [1, 1]} : vector<8x128xf32> to vector<8x32xf32>
    %102 = arith.truncf %101 : vector<8x32xf32> to vector<8x32xbf16>
    %cst_38 = arith.constant dense<0.000000e+00> : vector<8x8xf32>
    %103 = tpu.matmul %100, %102, %cst_38 {dimension_numbers = #tpu.dot_dimension_numbers<[1], [1], [0], [0], [0, 0, 1, 0], [], []>} : vector<8x32xbf16>, vector<8x32xbf16>, vector<8x8xf32> -> vector<8x8xf32>
    %cst_39 = arith.constant dense<0xFF800000> : vector<8xf32>
    %104 = vector.multi_reduction <maximumf>, %103, %cst_39 [0] : vector<8x8xf32> to vector<8xf32>
    %105 = vector.shape_cast %104 : vector<8xf32> to vector<1x8xf32>
    %106 = vector.broadcast %105 : vector<1x8xf32> to vector<8x8xf32>
    %107 = arith.subf %103, %106 : vector<8x8xf32>
    %108 = math.exp %107 : vector<8x8xf32>
    %cst_40 = arith.constant dense<0.000000e+00> : vector<8xf32>
    %109 = vector.multi_reduction <add>, %108, %cst_40 [0] : vector<8x8xf32> to vector<8xf32>
    %110 = vector.shape_cast %109 : vector<8xf32> to vector<1x8xf32>
    %111 = math.log %110 : vector<1x8xf32>
    %112 = arith.addf %111, %105 : vector<1x8xf32>
    %cst_41 = arith.constant 0.000000e+00 : f32
    %113 = vector.broadcast %cst_41 : f32 to vector<8x8xf32>
    %114 = arith.select %8, %103, %113 : vector<8x8xi1>, vector<8x8xf32>
    %cst_42 = arith.constant dense<0.000000e+00> : vector<8xf32>
    %115 = vector.multi_reduction <add>, %114, %cst_42 [0] : vector<8x8xf32> to vector<8xf32>
    %116 = vector.shape_cast %115 : vector<8xf32> to vector<1x8xf32>
    %117 = arith.subf %116, %112 : vector<1x8xf32>
    %118 = math.exp %117 : vector<1x8xf32>
    %cst_43 = arith.constant 1.000000e+00 : f32
    %119 = vector.broadcast %cst_43 : f32 to vector<1x8xf32>
    %120 = arith.subf %119, %118 : vector<1x8xf32>
    %cst_44 = arith.constant 1.000000e+00 : f32
    %121 = vector.broadcast %cst_44 : f32 to vector<1x8xf32>
    %122 = arith.mulf %120, %120 : vector<1x8xf32>
    %123 = arith.mulf %121, %122 : vector<1x8xf32>
    %cst_45 = arith.constant 0.000000e+00 : f32
    %124 = vector.broadcast %cst_45 : f32 to vector<1x8xf32>
    %125 = arith.cmpf oeq, %123, %124 : vector<1x8xf32>
    %cst_46 = arith.constant 1.000000e+00 : f32
    %126 = vector.broadcast %cst_46 : f32 to vector<1x8xf32>
    %127 = arith.select %125, %126, %123 : vector<1x8xi1>, vector<1x8xf32>
    %128 = arith.mulf %127, %117 : vector<1x8xf32>
    %129 = arith.addf %99, %128 : vector<1x8xf32>
    %130 = vector.broadcast %105 : vector<1x8xf32> to vector<8x8xf32>
    %131 = arith.cmpf oeq, %103, %130 : vector<8x8xf32>
    %c8_i32 = arith.constant 8 : i32
    %132 = vector.broadcast %c8_i32 : i32 to vector<8x8xi32>
    %133 = arith.select %131, %6, %132 : vector<8x8xi1>, vector<8x8xi32>
    %cst_47 = arith.constant dense<2147483647> : vector<8xi32>
    %134 = vector.multi_reduction <minsi>, %133, %cst_47 [0] : vector<8x8xi32> to vector<8xi32>
    %135 = vector.shape_cast %134 : vector<8xi32> to vector<1x8xi32>
    %136 = tpu.iota {dimensions = array<i32: 1>} : vector<1x8xi32>
    %137 = arith.cmpi eq, %135, %136 : vector<1x8xi32>
    %138 = arith.extui %137 : vector<1x8xi1> to vector<1x8xi32>
    %139 = arith.sitofp %138 : vector<1x8xi32> to vector<1x8xf32>
    %cst_48 = arith.constant dense<0.000000e+00> : vector<1xf32>
    %140 = vector.multi_reduction <add>, %139, %cst_48 [1] : vector<1x8xf32> to vector<1xf32>
    %141 = vector.shape_cast %140 : vector<1xf32> to vector<1x1xf32>
    %cst_49 = arith.constant 1.250000e-01 : f32
    %142 = vector.broadcast %cst_49 : f32 to vector<1x1xf32>
    %143 = arith.mulf %141, %142 : vector<1x1xf32>
    %cst_50 = arith.constant dense<0.000000e+00> : vector<1xf32>
    %144 = vector.multi_reduction <add>, %129, %cst_50 [1] : vector<1x8xf32> to vector<1xf32>
    %145 = vector.shape_cast %144 : vector<1xf32> to vector<1x1xf32>
    %cst_51 = arith.constant -3.125000e-02 : f32
    %146 = vector.broadcast %cst_51 : f32 to vector<1x1xf32>
    %147 = arith.mulf %145, %146 : vector<1x1xf32>
    %148 = tpu.iota {dimensions = array<i32: 1>} : vector<1x128xi32>
    %c0_i32 = arith.constant 0 : i32
    %149 = vector.broadcast %c0_i32 : i32 to vector<1x128xi32>
    %150 = arith.cmpi eq, %148, %149 : vector<1x128xi32>
    %cst_52 = arith.constant 0.000000e+00 : f32
    %151 = vector.shape_cast %147 : vector<1x1xf32> to vector<1x1xf32>
    %152 = vector.broadcast %151 : vector<1x1xf32> to vector<1x128xf32>
    %153 = vector.broadcast %cst_52 : f32 to vector<1x128xf32>
    %154 = arith.select %150, %152, %153 : vector<1x128xi1>, vector<1x128xf32>
    %c1_i32 = arith.constant 1 : i32
    %155 = vector.broadcast %c1_i32 : i32 to vector<1x128xi32>
    %156 = arith.cmpi eq, %148, %155 : vector<1x128xi32>
    %cst_53 = arith.constant 0.000000e+00 : f32
    %157 = vector.shape_cast %143 : vector<1x1xf32> to vector<1x1xf32>
    %158 = vector.broadcast %157 : vector<1x1xf32> to vector<1x128xf32>
    %159 = vector.broadcast %cst_53 : f32 to vector<1x128xf32>
    %160 = arith.select %156, %158, %159 : vector<1x128xi1>, vector<1x128xf32>
    %161 = arith.addf %154, %160 : vector<1x128xf32>
    %c0_54 = arith.constant 0 : index
    %c0_55 = arith.constant 0 : index
    %162 = vector.load %arg4[%c0_54, %c0_55] : memref<1x128xf32, #tpu.memory_space<vmem>>, vector<1x128xf32>
    tpu.vector_store %arg4[%c0_54, %c0_55], %161 {strides = array<i32>} : memref<1x128xf32, #tpu.memory_space<vmem>>, vector<1x128xf32>,
    return
  }
}

</mosaic_0001>

<bundles_post_ra>
// kernel: nce_loss_pallas.1
= control target key start
LH: loop header
LB: loop body
LE: loop exit
PB: predicated region body
PF: predicated region fallthrough
CT: control target
= control target key end

     0   :  { %v560_v0 = vmov 0.0   ;;  %vm561_vm0 = vmmov 0   ;;  %vm42_vm1 = vcmask 261120   ;;  %vm139_vm2 = vcmask 64512   ;;  %s704_s2 = inlined_call_operand.vmem [shape: bf16[32,128], index: 2, kind: input, shape index: {}]   ;;  %s705_s0 = inlined_call_operand.vmem [shape: bf16[8,32], index: 0, kind: input, shape index: {}]   ;;  %s706_s1 = inlined_call_operand.vmem [shape: bf16[8,128], index: 1, kind: input, shape index: {}]   ;;  %s707_s3 = inlined_call_operand.vmem [shape: f32[1,128], index: 3, kind: input, shape index: {}]   ;;  %s708_s4 = inlined_call_operand.vmem [shape: f32[1,128], index: 4, kind: output, shape index: {}]  }
   0x1   :  { %496 = vmatprep.subr.bf16.mxu0 %v560_v0  ;;  %v533_v1 = vld [vmem:[%s704_s2] sm:$0xff]   ;;  %500 = vmatprep.mubr.msk.bf16.mxu0 %vm561_vm0, %v560_v0  ;;  %v534_v2 = vld [vmem:[%s704_s2 + $0x8] sm:$0xff]   ;;  %s562_s2 = smov 96   ;;  %v86_v39 = vlaneseq }
   0x2   :  { %504 = vmatprep.subr.bf16.mxu1 %v560_v0  ;;  %506 = vmatprep.mubr.msk.bf16.mxu1 %vm561_vm0, %v560_v0  ;;  %v18_v3 = vld [vmem:[%s705_s0] sm:$0xf]  ;;  %s563_s0 = smov 32  }
   0x3   :  { %497 = vmatpush3.bf16.msra.mxu0 %v533_v1  ;;  %v91_v4 = vld [vmem:[%s706_s1] sm:$0xf]  ;;  %s564_s1 = smov 64   ;;  %v639_v47 = vshrl.u32 %v86_v39, 7  ;;  %v641_v48 = vand.u32 127, %v86_v39 }
   0x4   :  { %498 = vmatprep.subr.bf16.mxu0 %v560_v0  ;;  %v480_v5 = vcombine.low %v91_v4, %v91_v4  ;;  %v475_v6 = vld [vmem:[%s707_s3] ss:$0 sm:$0xff] }
   0x5   :  { %vm90_vm3 = vcmp.eq.s32.totalorder %v639_v47, %v641_v48  ;;  %vm467_vm13 = vcmp.eq.s32.totalorder %v641_v48, 1  ;;  %vm465_vm14 = vcmp.eq.s32.totalorder %v641_v48, 0 }
   0x6   :  { %180 = vrot.lane.b32.xlu1 %v480_v5, %s562_s2 }
   0x7   :  { %499 = vmatpush3.bf16.msra.mxu0 %v534_v2 }
   0x8   :  { %510 = vmatprep.subr.bf16.mxu0 %v560_v0 }
   0xa   :  { %501 = vmatmul.mubr.msk.bf16.vlgmr.msra.gmra.mrb[0].mxu0 %vm42_vm1, %v18_v3 }
   0xb   :  { %512 = vmatprep.mubr.msk.bf16.mxu0 %vm561_vm0, %v560_v0 }
  0x78   :  { %v181_v14 = vpop.permute.xlu1 %180 }
  0xdd   :  { %v80_v7 = vpop.f32.mrb[0].mxu0 }
  0xde   :  { %v81_v8 = vadd.f32 %v475_v6, %v80_v7  ;;  %v502_v9 = vpop.f32.mrb[1].mxu0 }
  0xdf   :  { %v83_v10 = vpop.f32.mrb[2].mxu0 }
  0xe0   :  { %v92_v11 = vpack.c.bf16 %v81_v8, %v81_v8  ;;  %v503_v12 = vpop.f32.mrb[3].mxu0 }
  0xe2   :  { %357 = vrot.lane.b32.xlu1 %v92_v11, %s563_s0  ;;  %183 = vrot.lane.b32.xlu0 %v92_v11, %s562_s2  ;;  %v97_v13 = vsel %vm42_vm1, %v92_v11, 0 }
  0xe3   :  { %505 = vmatpush3.bf16.xpose.msra.mxu1 %v97_v13 }
  0xe4   :  { %516 = vmatprep.subr.bf16.mxu1 %v560_v0 }
  0xe6   :  { %270 = vrot.lane.b32.xlu0 %v92_v11, %s564_s1  ;;  %355 = vrot.lane.b32.xlu1 %v480_v5, %s563_s0 }
  0xea   :  { %268 = vrot.lane.b32.xlu0 %v480_v5, %s564_s1  ;;  %507 = vmatmul.mubr.msk.bf16.vlgmr.msra.gmra.mrb[0].mxu1 %vm42_vm1, %v91_v4 }
  0xeb   :  { %518 = vmatprep.mubr.msk.bf16.mxu1 %vm561_vm0, %v560_v0 }
 0x154   :  { %v184_v15 = vpop.permute.xlu0 %183  ;;  %v358_v19 = vpop.permute.xlu1 %357 }
 0x155   :  { %v189_v16 = vsel %vm42_vm1, %v184_v15, 0  ;;  %v363_v20 = vsel %vm42_vm1, %v358_v19, 0 }
 0x156   :  { %511 = vmatpush3.bf16.xpose.msra.mxu0 %v189_v16 }
 0x157   :  { %522 = vmatprep.subr.bf16.mxu0 %v560_v0 }
 0x158   :  { %v271_v17 = vpop.permute.xlu0 %270  ;;  %v356_v22 = vpop.permute.xlu1 %355 }
 0x159   :  { %v276_v18 = vsel %vm42_vm1, %v271_v17, 0 }
 0x15a   :  { %517 = vmatpush3.bf16.xpose.msra.mxu1 %v276_v18 }
 0x15c   :  { %v269_v21 = vpop.permute.xlu0 %268 }
 0x15d   :  { %513 = vmatmul.mubr.msk.bf16.vlgmr.msra.gmra.mrb[4].mxu0 %vm42_vm1, %v181_v14 }
 0x15e   :  { %523 = vmatpush3.bf16.xpose.msra.mxu0 %v363_v20  ;;  %524 = vmatprep.mubr.msk.bf16.mxu0 %vm561_vm0, %v560_v0 }
 0x161   :  { %519 = vmatmul.mubr.msk.bf16.vlgmr.msra.gmra.mrb[4].mxu1 %vm42_vm1, %v269_v21 }
 0x165   :  { %525 = vmatmul.mubr.msk.bf16.vlgmr.msra.gmra.mrb[8].mxu0 %vm42_vm1, %v356_v22 }
 0x1bd   :  { %v133_v23 = vpop.f32.mrb[0].mxu1 }
 0x1be   :  { %v508_v24 = vpop.f32.mrb[1].mxu1  ;;  %v140_v27 = vsel %vm139_vm2, %v133_v23, -inf  ;;  %v160_v5 = vsel %vm90_vm3, %v133_v23, 0.0 }
 0x1bf   :  { %v136_v25 = vpop.f32.mrb[2].mxu1  ;;  %v141_v28 = vrot.slane %v140_v27, 4  ;;  %v161_v11 = vsel %vm139_vm2, %v160_v5, 0.0 }
 0x1c0   :  { %v509_v26 = vpop.f32.mrb[3].mxu1  ;;  %v162_v19 = vrot.slane %v161_v11, 4 }
 0x1c1   :  { %v142_v29 = vmax.f32 %v140_v27, %v141_v28 }
 0x1c2   :  { %v163_v24 = vadd.f32 %v162_v19, %v161_v11 }
 0x1c3   :  { %v143_v30 = vrot.slane %v142_v29, 2 }
 0x1c5   :  { %v144_v31 = vmax.f32 %v142_v29, %v143_v30  ;;  %v164_v29 = vrot.slane %v163_v24, 2 }
 0x1c7   :  { %v145_v32 = vrot.slane %v144_v31, 1 }
 0x1c9   :  { %v631_v33 = vmax.f32 %v144_v31, %v145_v32 }
 0x1cb   :  { %v147_v34 = vsub.f32 %v133_v23, %v631_v33 }
 0x1cd   :  { %v148_v35 = vmul.f32 1.442695, %v147_v34  ;;  %v165_v34 = vadd.f32 %v164_v29, %v163_v24 }
 0x1cf   :  { %536 = vpow2.f32 %v148_v35 }
 0x1d9   :  { %v537_v36 = vpop.eup %536 }
 0x1da   :  { %v150_v37 = vsel %vm139_vm2, %v537_v36, 0.0 }
 0x1db   :  { %v151_v38 = vrot.slane %v150_v37, 4 }
 0x1dd   :  { %v152_v41 = vadd.f32 %v151_v38, %v150_v37 }
 0x1df   :  { %v153_v51 = vrot.slane %v152_v41, 2 }
 0x1e1   :  { %v154_v61 = vadd.f32 %v153_v51, %v152_v41 }
 0x1e3   :  { %v155_v10 = vrot.slane %v154_v61, 1 }
 0x1e5   :  { %v156_v18 = vadd.f32 %v155_v10, %v154_v61 }
 0x230   :  { %v635_v40 = vpop.f32.mrb[4].mxu0 }
 0x231   :  { %v231_v42 = vsel %vm139_vm2, %v635_v40, -inf  ;;  %v514_v43 = vpop.f32.mrb[5].mxu0  ;;  %v251_v36 = vsel %vm90_vm3, %v635_v40, 0.0 }
 0x232   :  { %v232_v44 = vrot.slane %v231_v42, 4  ;;  %v228_v45 = vpop.f32.mrb[6].mxu0  ;;  %v252_v43 = vsel %vm139_vm2, %v251_v36, 0.0 }
 0x233   :  { %v515_v46 = vpop.f32.mrb[7].mxu0  ;;  %v166_v45 = vrot.slane %v165_v34, 1 }
 0x234   :  { %v233_v49 = vmax.f32 %v231_v42, %v232_v44  ;;  %v643_v50 = vpop.f32.mrb[4].mxu1 }
 0x235   :  { %v318_v52 = vsel %vm139_vm2, %v643_v50, -inf  ;;  %v520_v53 = vpop.f32.mrb[5].mxu1  ;;  %v167_v61 = vadd.f32 %v166_v45, %v165_v34 }
 0x236   :  { %v234_v54 = vrot.slane %v233_v49, 2  ;;  %v319_v55 = vrot.slane %v318_v52, 4  ;;  %v315_v56 = vpop.f32.mrb[6].mxu1 }
 0x237   :  { %v521_v57 = vpop.f32.mrb[7].mxu1 }
 0x238   :  { %v235_v58 = vmax.f32 %v233_v49, %v234_v54  ;;  %v320_v59 = vmax.f32 %v318_v52, %v319_v55  ;;  %v649_v60 = vpop.f32.mrb[8].mxu0  ;;  %v338_v49 = vsel %vm90_vm3, %v643_v50, 0.0  ;;  %v253_v54 = vrot.slane %v252_v43, 4 }
 0x239   :  { %v405_v62 = vsel %vm139_vm2, %v649_v60, -inf  ;;  %v526_v63 = vpop.f32.mrb[9].mxu0 }
 0x23a   :  { %v236_v1 = vrot.slane %v235_v58, 1  ;;  %v321_v2 = vrot.slane %v320_v59, 2  ;;  %v406_v3 = vrot.slane %v405_v62, 4  ;;  %v402_v4 = vpop.f32.mrb[10].mxu0  ;;  %v254_v5 = vadd.f32 %v253_v54, %v252_v43 }
 0x23b   :  { %v527_v6 = vpop.f32.mrb[11].mxu0 }
 0x23c   :  { %v656_v7 = vmax.f32 %v235_v58, %v236_v1  ;;  %v322_v8 = vmax.f32 %v320_v59, %v321_v2  ;;  %v407_v9 = vmax.f32 %v405_v62, %v406_v3  ;;  %v339_v58 = vsel %vm139_vm2, %v338_v49, 0.0 }
 0x23d   :  { %v340_v6 = vrot.slane %v339_v58, 4 }
 0x23e   :  { %v238_v12 = vsub.f32 %v635_v40, %v656_v7  ;;  %v323_v13 = vrot.slane %v322_v8, 1  ;;  %v408_v14 = vrot.slane %v407_v9, 2 }
 0x240   :  { %v239_v15 = vmul.f32 1.442695, %v238_v12  ;;  %v661_v16 = vmax.f32 %v322_v8, %v323_v13  ;;  %v409_v17 = vmax.f32 %v407_v9, %v408_v14  ;;  %v255_v14 = vrot.slane %v254_v5, 2 }
 0x242   :  { %538 = vpow2.f32 %v239_v15  ;;  %v325_v20 = vsub.f32 %v643_v50, %v661_v16  ;;  %v410_v21 = vrot.slane %v409_v17, 1  ;;  %v425_v50 = vsel %vm90_vm3, %v649_v60, 0.0 }
 0x243   :  { %540 = vlog2.f32 %v156_v18  ;;  %v426_v11 = vsel %vm139_vm2, %v425_v50, 0.0  ;;  %v341_v15 = vadd.f32 %v340_v6, %v339_v58 }
 0x244   :  { %v326_v22 = vmul.f32 1.442695, %v325_v20  ;;  %v665_v23 = vmax.f32 %v409_v17, %v410_v21  ;;  %v427_v17 = vrot.slane %v426_v11, 4  ;;  %v256_v20 = vadd.f32 %v255_v14, %v254_v5 }
 0x245   :  { %v342_v21 = vrot.slane %v341_v15, 2 }
 0x246   :  { %542 = vpow2.f32 %v326_v22  ;;  %v412_v25 = vsub.f32 %v649_v60, %v665_v23  ;;  %vm442_vm4 = vcmp.eq.f32.partialorder %v649_v60, %v665_v23  ;;  %v428_v22 = vadd.f32 %v427_v17, %v426_v11 }
 0x247   :  { %v443_v26 = vsel %vm442_vm4, %v639_v47, 8 }
 0x248   :  { %v413_v27 = vmul.f32 1.442695, %v412_v25  ;;  %v444_v28 = vsel %vm139_vm2, %v443_v26, 2147483647  ;;  %v257_v25 = vrot.slane %v256_v20, 1  ;;  %v343_v26 = vadd.f32 %v342_v21, %v341_v15 }
 0x249   :  { %v445_v30 = vrot.slane %v444_v28, 4 }
 0x24a   :  { %544 = vpow2.f32 %v413_v27  ;;  %v429_v27 = vrot.slane %v428_v22, 2 }
 0x24b   :  { %vm446_vm5 = vcmp.lt.s32.totalorder %v444_v28, %v445_v30 }
 0x24c   :  { %v539_v31 = vpop.eup %538  ;;  %v447_v32 = vsel %vm446_vm5, %v444_v28, %v445_v30  ;;  %v430_v34 = vadd.f32 %v429_v27, %v428_v22 }
 0x24d   :  { %v241_v35 = vsel %vm139_vm2, %v539_v31, 0.0  ;;  %v448_v37 = vrot.slane %v447_v32, 2  ;;  %v541_v39 = vpop.eup %540  ;;  %v258_v31 = vadd.f32 %v257_v25, %v256_v20 }
 0x24e   :  { %v242_v38 = vrot.slane %v241_v35, 4  ;;  %v158_v53 = vmul.f32 0.6931472, %v541_v39 }
 0x24f   :  { %vm449_vm6 = vcmp.lt.s32.totalorder %v447_v32, %v448_v37 }
 0x250   :  { %v543_v41 = vpop.eup %542  ;;  %v243_v42 = vadd.f32 %v242_v38, %v241_v35  ;;  %v450_v44 = vsel %vm449_vm6, %v447_v32, %v448_v37  ;;  %v159_v4 = vadd.f32 %v158_v53, %v631_v33  ;;  %v344_v32 = vrot.slane %v343_v26, 1 }
 0x251   :  { %v328_v46 = vsel %vm139_vm2, %v543_v41, 0.0  ;;  %v451_v51 = vrot.slane %v450_v44, 1 }
 0x252   :  { %v244_v52 = vrot.slane %v243_v42, 2  ;;  %v329_v40 = vrot.slane %v328_v46, 4  ;;  %v168_v13 = vsub.f32 %v167_v61, %v159_v4  ;;  %v345_v41 = vadd.f32 %v344_v32, %v343_v26 }
 0x253   :  { %vm452_vm7 = vcmp.lt.s32.totalorder %v450_v44, %v451_v51 }
 0x254   :  { %v545_v55 = vpop.eup %544  ;;  %v245_v56 = vadd.f32 %v244_v52, %v243_v42  ;;  %v330_v57 = vadd.f32 %v329_v40, %v328_v46  ;;  %v453_v59 = vsel %vm452_vm7, %v450_v44, %v451_v51  ;;  %v169_v19 = vmul.f32 1.442695, %v168_v13 }
 0x255   :  { %v415_v62 = vsel %vm139_vm2, %v545_v55, 0.0  ;;  %vm454_vm8 = vcmp.eq.s32.totalorder %v453_v59, %v641_v48  ;;  %v431_v42 = vrot.slane %v430_v34, 1 }
 0x256   :  { %v246_v63 = vrot.slane %v245_v56, 1  ;;  %v331_v1 = vrot.slane %v330_v57, 2  ;;  %v416_v2 = vrot.slane %v415_v62, 4  ;;  %v484_v3 = vsel %vm454_vm8, 1.0, %v560_v0 }
 0x257   :  { %v457_v8 = vsel %vm139_vm2, %v484_v3, 0.0 }
 0x258   :  { %v247_v9 = vadd.f32 %v246_v63, %v245_v56  ;;  %v332_v10 = vadd.f32 %v331_v1, %v330_v57  ;;  %458 = vadd.xlane.f32.xlu0 %v457_v8  ;;  %v417_v47 = vadd.f32 %v416_v2, %v415_v62 }
 0x25a   :  { %546 = vlog2.f32 %v247_v9  ;;  %v333_v60 = vrot.slane %v332_v10, 1  ;;  %v418_v12 = vrot.slane %v417_v47, 2 }
 0x25c   :  { %v334_v0 = vadd.f32 %v333_v60, %v332_v10  ;;  %v419_v18 = vadd.f32 %v418_v12, %v417_v47 }
 0x25e   :  { %548 = vlog2.f32 %v334_v0  ;;  %v420_v33 = vrot.slane %v419_v18, 1 }
 0x260   :  { %v421_v24 = vadd.f32 %v420_v33, %v419_v18 }
 0x262   :  { %550 = vlog2.f32 %v421_v24 }
 0x263   :  { %552 = vpow2.f32 %v169_v19 }
 0x264   :  { %v547_v28 = vpop.eup %546 }
 0x265   :  { %v249_v29 = vmul.f32 0.6931472, %v547_v28 }
 0x267   :  { %v250_v30 = vadd.f32 %v249_v29, %v656_v7  ;;  %v432_v7 = vadd.f32 %v431_v42, %v430_v34 }
 0x268   :  { %v549_v35 = vpop.eup %548 }
 0x269   :  { %v259_v36 = vsub.f32 %v258_v31, %v250_v30  ;;  %v336_v37 = vmul.f32 0.6931472, %v549_v35 }
 0x26b   :  { %v260_v38 = vmul.f32 1.442695, %v259_v36  ;;  %v337_v39 = vadd.f32 %v336_v37, %v661_v16 }
 0x26c   :  { %v551_v43 = vpop.eup %550 }
 0x26d   :  { %v553_v44 = vpop.eup %552  ;;  %554 = vpow2.f32 %v260_v38  ;;  %v346_v45 = vsub.f32 %v345_v41, %v337_v39  ;;  %v423_v46 = vmul.f32 0.6931472, %v551_v43 }
 0x26e   :  { %v171_v52 = vsub.f32 1.0, %v553_v44 }
 0x26f   :  { %v347_v49 = vmul.f32 1.442695, %v346_v45  ;;  %v424_v51 = vadd.f32 %v423_v46, %v665_v23 }
 0x270   :  { %v172_v54 = vmul.f32 %v171_v52, %v171_v52 }
 0x271   :  { %556 = vpow2.f32 %v347_v49  ;;  %v433_v40 = vsub.f32 %v432_v7, %v424_v51 }
 0x272   :  { %vm173_vm9 = vcmp.eq.f32.partialorder %v172_v54, 0.0 }
 0x273   :  { %v434_v53 = vmul.f32 1.442695, %v433_v40  ;;  %v174_v58 = vsel %vm173_vm9, 1.0, %v172_v54 }
 0x274   :  { %v175_v62 = vmul.f32 %v174_v58, %v168_v13 }
 0x275   :  { %558 = vpow2.f32 %v434_v53 }
 0x277   :  { %v555_v55 = vpop.eup %554 }
 0x278   :  { %v262_v16 = vsub.f32 1.0, %v555_v55 }
 0x27a   :  { %v263_v56 = vmul.f32 %v262_v16, %v262_v16 }
 0x27b   :  { %v557_v57 = vpop.eup %556 }
 0x27c   :  { %vm264_vm10 = vcmp.eq.f32.partialorder %v263_v56, 0.0  ;;  %v349_v59 = vsub.f32 1.0, %v557_v57 }
 0x27d   :  { %v265_v61 = vsel %vm264_vm10, 1.0, %v263_v56 }
 0x27e   :  { %v266_v50 = vmul.f32 %v265_v61, %v259_v36  ;;  %v350_v63 = vmul.f32 %v349_v59, %v349_v59 }
 0x27f   :  { %v559_v23 = vpop.eup %558 }
 0x280   :  { %v267_v1 = vadd.f32 %v266_v50, %v175_v62  ;;  %vm351_vm11 = vcmp.eq.f32.partialorder %v350_v63, 0.0  ;;  %v436_v2 = vsub.f32 1.0, %v559_v23 }
 0x281   :  { %v352_v3 = vsel %vm351_vm11, 1.0, %v350_v63 }
 0x282   :  { %v353_v4 = vmul.f32 %v352_v3, %v346_v45  ;;  %v437_v5 = vmul.f32 %v436_v2, %v436_v2 }
 0x284   :  { %v354_v6 = vadd.f32 %v353_v4, %v267_v1  ;;  %vm438_vm12 = vcmp.eq.f32.partialorder %v437_v5, 0.0 }
 0x285   :  { %v439_v8 = vsel %vm438_vm12, 1.0, %v437_v5 }
 0x286   :  { %v440_v9 = vmul.f32 %v439_v8, %v433_v40 }
 0x288   :  { %v441_v10 = vadd.f32 %v440_v9, %v354_v6 }
 0x28a   :  { %v461_v11 = vsel %vm139_vm2, %v441_v10, 0.0 }
 0x28b   :  { %462 = vadd.xlane.f32.xlu1 %v461_v11 }
 0x2e5   :  { %v459_v47 = vpop.xlane.xlu0 %458 }
 0x2e6   :  { %v460_v60 = vmul.f32 0.125, %v459_v47 }
 0x2e8   :  { %v468_v14 = vsel %vm467_vm13, %v460_v60, 0.0 }
 0x318   :  { %v463_v12 = vpop.xlane.xlu1 %462 }
 0x319   :  { %v464_v13 = vmul.f32 -0.03125, %v463_v12 }
 0x31b   :  { %v466_v15 = vsel %vm465_vm14, %v464_v13, 0.0 }
 0x31c   :  { %v469_v17 = vadd.f32 %v468_v14, %v466_v15 }
 0x31e   :  { %470 = vst [vmem:[%s708_s4] sm:$0x1] %v469_v17 }

</bundles_post_ra>
